<compile_context>
chip_gen: v6e
topology: v6e:2x2x1
jax: 0.10.0
libtpu: 0.0.40
codegen_flags: <defaults>
</compile_context>

<pallas_src>
import functools

import jax
import jax.numpy as jnp
from jax import lax
from jax.experimental import pallas as pl
from jax.experimental.pallas import tpu as pltpu


def _rmsnorm_kernel(x_ref, g_ref, o_ref, *, scale, eps):
    # x_ref: (TM, D) tile, g_ref: (1, D) gamma, o_ref: (TM, D)
    xf = x_ref[...].astype(jnp.float32)
    gf = g_ref[...].astype(jnp.float32)                       # (1, D), broadcasts over rows
    # Per-row sum of squares, accumulated in f32 (XLU lane reduction).
    sumsq = jnp.sum(xf * xf, axis=-1, keepdims=True)          # (TM, 1)
    # 1 / max(||x||, eps) == rsqrt(max(sumsq, eps^2)); rsqrt issues on the EUP slot.
    inv = scale * lax.rsqrt(jnp.maximum(sumsq, eps * eps))    # (TM, 1)
    o_ref[...] = ((xf * inv) * gf).astype(o_ref.dtype)


def _sublane_multiple(dtype):
    itemsize = jnp.dtype(dtype).itemsize
    return {4: 8, 2: 16, 1: 32}.get(itemsize, 8)


def _choose_block_rows(n_rows, dim, dtype, vmem_tile_budget=24 * 1024 * 1024):
    """Pick a row-tile that amortizes per-step overhead but fits VMEM on all gens."""
    itemsize = jnp.dtype(dtype).itemsize
    # Double-buffered input + output tiles (input dtype) + ~2 f32 compute temps.
    per_row_bytes = dim * (4 * itemsize + 2 * 4)
    sub = _sublane_multiple(dtype)
    br = vmem_tile_budget // max(per_row_bytes, 1)
    br = min(br, 1024)                       # keep grid length useful (megacore on v7x)
    br = max(sub, (br // sub) * sub)         # legal sublane tiling
    if br >= n_rows:
        return n_rows                        # full-extent block: always legal
    return br


def rmsnorm(x, gamma, *, block_rows=None, eps=1e-12,
            vmem_limit_bytes=48 * 1024 * 1024):
    """gamma * F.normalize(x, dim=-1) * sqrt(dim), Pallas TPU kernel."""
    orig_shape = x.shape
    dim = orig_shape[-1]
    assert gamma.shape == (dim,)
    scale = float(dim) ** 0.5

    n_rows = 1
    for s in orig_shape[:-1]:
        n_rows *= s
    x2d = x.reshape(n_rows, dim)
    g2d = gamma.reshape(1, dim)

    if block_rows is None:
        block_rows = _choose_block_rows(n_rows, dim, x.dtype)
    block_rows = min(block_rows, n_rows)

    # No host-side pad: Pallas handles the ragged last block; per-row math
    # means the tail's garbage rows never contaminate valid output rows.
    grid = (pl.cdiv(n_rows, block_rows),)

    kernel = functools.partial(_rmsnorm_kernel, scale=scale, eps=eps)

    out2d = pl.pallas_call(
        kernel,
        out_shape=jax.ShapeDtypeStruct((n_rows, dim), x.dtype),
        grid_spec=pltpu.PrefetchScalarGridSpec(
            num_scalar_prefetch=0,
            grid=grid,
            in_specs=[
                pl.BlockSpec((block_rows, dim), lambda i: (i, 0)),
                pl.BlockSpec((1, dim), lambda i: (0, 0)),  # gamma fetched once
            ],
            out_specs=pl.BlockSpec((block_rows, dim), lambda i: (i, 0)),
        ),
        compiler_params=pltpu.CompilerParams(
            dimension_semantics=("parallel",),
            vmem_limit_bytes=vmem_limit_bytes,
        ),
    )(x2d, g2d)

    return out2d.reshape(orig_shape)


def rmsnorm_reference(x, gamma, eps=1e-12):
    scale = float(x.shape[-1]) ** 0.5
    norm = jnp.sqrt(jnp.sum(x.astype(jnp.float32) ** 2, axis=-1, keepdims=True))
    return (gamma * x / jnp.maximum(norm, eps) * scale).astype(x.dtype)


if __name__ == "__main__":
    key = jax.random.PRNGKey(0)
    batch, seq, hidden = 2, 8, 32
    x = jax.random.normal(key, (batch, seq, hidden), dtype=jnp.float32)
    # deterministic parameter init: nn.Parameter(torch.ones(dim))
    gamma = jnp.ones((hidden,), dtype=jnp.float32)

    out = rmsnorm(x, gamma)
    out = jax.block_until_ready(out)

    ref = rmsnorm_reference(x, gamma)
    assert out.shape == x.shape
    assert jnp.allclose(out, ref, atol=1e-5, rtol=1e-5)

    print("KERNEL_OK")
</pallas_src>

<mosaic_0001>
module attributes {stable_mosaic.version = 11 : i64} {
  func.func @_rmsnorm_kernel(%arg0: i32, %arg1: memref<16x32xf32, #tpu.memory_space<vmem>>, %arg2: memref<1x32xf32, #tpu.memory_space<vmem>>, %arg3: memref<16x32xf32, #tpu.memory_space<vmem>>) attributes {dimension_semantics = [#tpu.dimension_semantics<parallel>], iteration_bounds = array<i64: 1>, scalar_prefetch = 0 : i64, scratch_operands = 0 : i64, tpu.core_type = #tpu.core_type<tc>, window_params = [{transform_indices = @transform_0, window_bounds = array<i64: 16, 32>}, {pipeline_mode = #tpu.pipeline_mode<synchronous>, transform_indices = @transform_1, window_bounds = array<i64: 1, 32>}, {transform_indices = @transform_2, window_bounds = array<i64: 16, 32>}]} {
    %c0 = arith.constant 0 : index
    %c0_0 = arith.constant 0 : index
    %0 = vector.load %arg1[%c0, %c0_0] : memref<16x32xf32, #tpu.memory_space<vmem>>, vector<16x32xf32>
    %c0_1 = arith.constant 0 : index
    %c0_2 = arith.constant 0 : index
    %1 = vector.load %arg2[%c0_1, %c0_2] : memref<1x32xf32, #tpu.memory_space<vmem>>, vector<1x32xf32>
    %2 = arith.mulf %0, %0 : vector<16x32xf32>
    %cst = arith.constant dense<0.000000e+00> : vector<16xf32>
    %3 = vector.multi_reduction <add>, %2, %cst [1] : vector<16x32xf32> to vector<16xf32>
    %4 = vector.shape_cast %3 : vector<16xf32> to vector<16x1xf32>
    %cst_3 = arith.constant 1.000000e-24 : f32
    %5 = vector.broadcast %cst_3 : f32 to vector<16x1xf32>
    %6 = arith.maximumf %4, %5 : vector<16x1xf32>
    %7 = math.rsqrt %6 : vector<16x1xf32>
    %cst_4 = arith.constant 5.65685415 : f32
    %8 = vector.broadcast %cst_4 : f32 to vector<16x1xf32>
    %9 = arith.mulf %8, %7 : vector<16x1xf32>
    %10 = vector.broadcast %9 : vector<16x1xf32> to vector<16x32xf32>
    %11 = arith.mulf %0, %10 : vector<16x32xf32>
    %12 = vector.broadcast %1 : vector<1x32xf32> to vector<16x32xf32>
    %13 = arith.mulf %11, %12 : vector<16x32xf32>
    %c0_5 = arith.constant 0 : index
    %c0_6 = arith.constant 0 : index
    %14 = vector.load %arg3[%c0_5, %c0_6] : memref<16x32xf32, #tpu.memory_space<vmem>>, vector<16x32xf32>
    tpu.vector_store %arg3[%c0_5, %c0_6], %13 {strides = array<i32>} : memref<16x32xf32, #tpu.memory_space<vmem>>, vector<16x32xf32>,
    return
  }
  func.func @transform_0(%arg0: i32) -> (i32, i32) {
    %c0_i32 = arith.constant 0 : i32
    %c0_i32_0 = arith.constant 0 : i32
    return %arg0, %c0_i32 : i32, i32
  }
  func.func @transform_1(%arg0: i32) -> (i32, i32) {
    %c0_i32 = arith.constant 0 : i32
    %c0_i32_0 = arith.constant 0 : i32
    %c0_i32_1 = arith.constant 0 : i32
    return %c0_i32, %c0_i32_0 : i32, i32
  }
  func.func @transform_2(%arg0: i32) -> (i32, i32) {
    %c0_i32 = arith.constant 0 : i32
    %c0_i32_0 = arith.constant 0 : i32
    return %arg0, %c0_i32 : i32, i32
  }
}

</mosaic_0001>

<bundles_post_ra>
// kernel: tpu_custom_call.1
= control target key start
LH: loop header
LB: loop body
LE: loop exit
PB: predicated region body
PF: predicated region fallthrough
CT: control target
= control target key end

     0   :  { %7 = vsyncpa [#allocation3], 0  ;;  %s164_s0 = inlined_call_operand.hbm [shape: f32[16,32], index: 0, kind: input, shape index: {}]   ;;  %s165_s1 = inlined_call_operand.vmem [shape: f32[1,32], index: 1, kind: input, shape index: {}]   ;;  %s166_s2 = inlined_call_operand.hbm [shape: f32[16,32], index: 2, kind: output, shape index: {}]  }
   0x1   :  { %8 = vsyncpa [#allocation4], 0  ;;  %s126_s9 = smov [#allocation2]  }
   0x2   :  { %s14_s10 = sshll.u32 %s126_s9, 4  ;;  %s15_s10 = int_to_ptr.vmem [resolvable:$true] %s14_s10 }
   0x3   :  { %s90_s11 = scalar_lea.vmem %s15_s10, 256  ;;  %p95_p1 = scmp.lt.s32.totalorder %s15_s10, %s15_s10 }
   0x4   :  { %p91_p0 = scmp.ne.s32.totalorder %s15_s10, %s90_s11  ;;  %p96_p2 = scmp.lt.s32.totalorder %s90_s11, %s90_s11 }
   0x6   :  { %p97_p3 = por %p96_p2, %p95_p1 }
   0x8   :  { %p98_p4 = pnand %p97_p3, %p91_p0 }
   0xa   :  { %101 = shalt.err (!%p98_p4)
}
   0xb   :  { %s127_s12 = smov 128   ;;  %s128_s13 = smov 8  }
   0xc   :  { %20 = dma.hbm_to_vmem [thread:$0]  %s164_s0, 256, %s15_s10, [#allocation3], %s127_s12, %s127_s12, %s128_s13  }
   0xd   :  { %122 = dma.done.wait [#allocation3], 256  }
   0xe   :  { %123 = vsyncadd [#allocation3], 4294967040  ;;  %v26_v0 = vld [vmem:[#allocation2] sm:$0xff]  ;;  %vm31_vm0 = vcmask 261120   ;;  %v27_v1 = vld [vmem:[#allocation2 + $0x8] sm:$0xff]  ;;  %s129_s17 = smov [#allocation5]  }
   0xf   :  { %v29_v2 = vmul.f32 %v26_v0, %v26_v0  ;;  %v30_v3 = vmul.f32 %v27_v1, %v27_v1  ;;  %v73_v12 = vld [vmem:[%s165_s1] ss:$0 sm:$0xff]  ;;  %s61_s18 = sshll.u32 %s129_s17, 4  ;;  %s62_s18 = int_to_ptr.vmem [resolvable:$true] %s61_s18 }
  0x10   :  { %s102_s19 = scalar_lea.vmem %s62_s18, 256  ;;  %p107_p6 = scmp.lt.s32.totalorder %s62_s18, %s62_s18 }
  0x11   :  { %v32_v4 = vsel %vm31_vm0, %v29_v2, 0.0  ;;  %v35_v5 = vsel %vm31_vm0, %v30_v3, 0.0  ;;  %p103_p5 = scmp.ne.s32.totalorder %s62_s18, %s102_s19  ;;  %p108_p7 = scmp.lt.s32.totalorder %s102_s19, %s102_s19 }
  0x12   :  { %33 = vadd.xlane.f32.xlu0 %v32_v4 }
  0x13   :  { %p109_p8 = por %p108_p7, %p107_p6 }
  0x15   :  { %p110_p9 = pnand %p109_p8, %p103_p5 }
  0x16   :  { %36 = vadd.xlane.f32.xlu0 %v35_v5 }
  0x9b   :  { %v34_v6 = vpop.xlane.xlu0 %33 }
  0x9c   :  { %v38_v7 = vmax.f32 %v34_v6, 1e-24 }
  0x9e   :  { %78 = vrsqrt.f32 %v38_v7 }
  0x9f   :  { %v37_v8 = vpop.xlane.xlu0 %36 }
  0xa0   :  { %v39_v9 = vmax.f32 %v37_v8, 1e-24 }
  0xa2   :  { %80 = vrsqrt.f32 %v39_v9 }
  0xab   :  { %v79_v10 = vpop.eup %78 }
  0xac   :  { %v42_v11 = vmul.f32 5.656854, %v79_v10 }
  0xae   :  { %v44_v13 = vmul.f32 %v42_v11, %v26_v0 }
  0xaf   :  { %v81_v14 = vpop.eup %80 }
  0xb0   :  { %v43_v15 = vmul.f32 5.656854, %v81_v14  ;;  %v52_v16 = vmul.f32 %v73_v12, %v44_v13 }
  0xb2   :  { %v45_v17 = vmul.f32 %v43_v15, %v27_v1  ;;  %54 = vst.msk [vmem:[#allocation5] sm:$0xff] %vm31_vm0, %v52_v16 }
  0xb4   :  { %v53_v18 = vmul.f32 %v73_v12, %v45_v17 }
  0xb6   :  { %55 = vst.msk [vmem:[#allocation5 + $0x8] sm:$0xff] %vm31_vm0, %v53_v18 }
  0xb7   :  { %113 = shalt.err (!%p110_p9)
}
  0xb8   :  { %67 = dma.vmem_to_hbm [thread:$0]  %s62_s18, 256, %s166_s2, [#allocation4], %s127_s12, %s127_s12, %s128_s13  }
  0xb9   :  { %124 = dma.done.wait [#allocation4], 256  }
  0xba   :  { %125 = vsyncadd [#allocation4], 4294967040 }
  0xbb   :  { %71 = vsyncpa [#allocation3], 1 }
  0xbc   :  { %72 = vsyncpa [#allocation4], 1 }

</bundles_post_ra>
